<compile_context>
chip_gen: v7x
topology: tpu7x:2x2x1
jax: 0.10.0
libtpu: 0.0.40
codegen_flags: <defaults>
</compile_context>

<pallas_src>
import jax
import jax.numpy as jnp
from jax import lax
from jax.experimental import pallas as pl
from jax.experimental.pallas import tpu as pltpu


def _decoder_kernel(x_ref, w_ref, b_ref, o_ref):
    # x_ref : (1, tT, H)  VMEM block (one batch element, tT sequence rows)
    # w_ref : (C, H)      VMEM, resident (constant index_map)
    # b_ref : (C, 1)      VMEM, resident
    # o_ref : (1, C, tT)  VMEM block -> lane-dense stores along T
    x = x_ref[0]                                   # (tT, H)
    w = w_ref[...]                                 # (C, H)
    # (C, H) . (tT, H) contracting on H -> (C, tT); fuses the output transpose.
    y = lax.dot_general(
        w, x,
        dimension_numbers=(((1,), (1,)), ((), ())),
        preferred_element_type=jnp.float32,
    )
    y = y + b_ref[...]                             # f32 bias add, broadcast over T
    o_ref[0] = y.astype(o_ref.dtype)


def _pick_seq_tile(T, H, C, bytes_per_elem=4, vmem_budget=24 * 1024 * 1024):
    """Largest lane-aligned (multiple of 128) sequence tile that divides T and
    keeps double-buffered x/out tiles + the resident weight under the budget."""
    resident = (C * H + C) * bytes_per_elem
    for tt in (512, 384, 256, 128):
        if T % tt == 0:
            need = 2 * (tt * H + C * tt) * bytes_per_elem + resident
            if need <= vmem_budget:
                return tt
    return T  # small / odd T: full sequence (block == full dim is always legal)


def decoder_forward(encoder, weight, bias):
    """encoder: (B, T, H); weight: (C, H) [PyTorch Linear layout]; bias: (C,).

    Returns logits of shape (B, C, T), matching the PyTorch module's forward.
    """
    B, T, H = encoder.shape
    C = weight.shape[0]
    tT = _pick_seq_tile(T, H, C)
    nT = T // tT

    b2d = bias.reshape(C, 1)  # (C, 1): broadcasts along the lane (T) axis

    logits = pl.pallas_call(
        _decoder_kernel,
        out_shape=jax.ShapeDtypeStruct((B, C, T), jnp.float32),
        grid_spec=pl.GridSpec(
            grid=(B, nT),
            in_specs=[
                # streaming activation tile
                pl.BlockSpec((1, tT, H), lambda b, t: (b, t, 0)),
                # weight / bias: constant index_map -> DMA'd once, stays resident
                pl.BlockSpec((C, H), lambda b, t: (0, 0)),
                pl.BlockSpec((C, 1), lambda b, t: (0, 0)),
            ],
            out_specs=pl.BlockSpec((1, C, tT), lambda b, t: (b, 0, t)),
        ),
        compiler_params=pltpu.CompilerParams(
            dimension_semantics=("parallel", "parallel"),
        ),
    )(encoder, weight, b2d)

    return logits


if __name__ == "__main__":
    # Small shapes consistent with the module's forward:
    #   encoder: (batch, seq, hidden); Linear(hidden -> num_classes)
    B, T, H, C = 2, 8, 32, 16

    key = jax.random.PRNGKey(0)
    k_x, k_w, k_b = jax.random.split(key, 3)

    encoder = jax.random.normal(k_x, (B, T, H), dtype=jnp.float32)
    # Deterministic synthetic parameters (PyTorch Linear layout: (C, H), (C,))
    weight = jax.random.normal(k_w, (C, H), dtype=jnp.float32) * 0.05
    bias = jax.random.normal(k_b, (C,), dtype=jnp.float32) * 0.01

    logits = decoder_forward(encoder, weight, bias)
    logits = jax.block_until_ready(logits)

    # Reference check against plain JAX (same math as the PyTorch forward).
    ref = jnp.transpose(encoder @ weight.T + bias, (0, 2, 1))
    assert logits.shape == (B, C, T), logits.shape
    assert jnp.allclose(logits, ref, atol=1e-5, rtol=1e-5)

    print("KERNEL_OK")
</pallas_src>

<mosaic_0001>
module attributes {stable_mosaic.version = 11 : i64} {
  func.func @_decoder_kernel(%arg0: i32, %arg1: i32, %arg2: memref<1x8x32xf32, #tpu.memory_space<vmem>>, %arg3: memref<16x32xf32, #tpu.memory_space<vmem>>, %arg4: memref<16x1xf32, #tpu.memory_space<vmem>>, %arg5: memref<1x16x8xf32, #tpu.memory_space<vmem>>) attributes {dimension_semantics = [#tpu.dimension_semantics<parallel>, #tpu.dimension_semantics<parallel>], iteration_bounds = array<i64: 2, 1>, scalar_prefetch = 0 : i64, scratch_operands = 0 : i64, tpu.core_type = #tpu.core_type<tc>, window_params = [{transform_indices = @transform_0, window_bounds = array<i64: 1, 8, 32>}, {pipeline_mode = #tpu.pipeline_mode<synchronous>, transform_indices = @transform_1, window_bounds = array<i64: 16, 32>}, {pipeline_mode = #tpu.pipeline_mode<synchronous>, transform_indices = @transform_2, window_bounds = array<i64: 16, 1>}, {transform_indices = @transform_3, window_bounds = array<i64: 1, 16, 8>}]} {
    %c0 = arith.constant 0 : index
    %c0_0 = arith.constant 0 : index
    %c0_1 = arith.constant 0 : index
    %0 = vector.load %arg2[%c0, %c0_0, %c0_1] : memref<1x8x32xf32, #tpu.memory_space<vmem>>, vector<1x8x32xf32>
    %1 = vector.shape_cast %0 : vector<1x8x32xf32> to vector<8x32xf32>
    %c0_2 = arith.constant 0 : index
    %c0_3 = arith.constant 0 : index
    %2 = vector.load %arg3[%c0_2, %c0_3] : memref<16x32xf32, #tpu.memory_space<vmem>>, vector<16x32xf32>
    %cst = arith.constant dense<0.000000e+00> : vector<16x8xf32>
    %3 = tpu.matmul %2, %1, %cst {dimension_numbers = #tpu.dot_dimension_numbers<[1], [1], [0], [0], [0, 0, 1, 0], [], []>} : vector<16x32xf32>, vector<8x32xf32>, vector<16x8xf32> -> vector<16x8xf32>
    %c0_4 = arith.constant 0 : index
    %c0_5 = arith.constant 0 : index
    %4 = vector.load %arg4[%c0_4, %c0_5] : memref<16x1xf32, #tpu.memory_space<vmem>>, vector<16x1xf32>
    %5 = vector.broadcast %4 : vector<16x1xf32> to vector<16x8xf32>
    %6 = arith.addf %3, %5 : vector<16x8xf32>
    %c0_6 = arith.constant 0 : index
    %c0_7 = arith.constant 0 : index
    %c0_8 = arith.constant 0 : index
    %7 = vector.load %arg5[%c0_6, %c0_7, %c0_8] : memref<1x16x8xf32, #tpu.memory_space<vmem>>, vector<1x16x8xf32>
    %8 = vector.shape_cast %7 : vector<1x16x8xf32> to vector<16x8xf32>
    %9 = vector.shape_cast %6 : vector<16x8xf32> to vector<1x16x8xf32>
    tpu.vector_store %arg5[%c0_6, %c0_7, %c0_8], %9 {strides = array<i32>} : memref<1x16x8xf32, #tpu.memory_space<vmem>>, vector<1x16x8xf32>,
    return
  }
  func.func @transform_0(%arg0: i32, %arg1: i32) -> (i32, i32, i32) {
    %c0_i32 = arith.constant 0 : i32
    %c0_i32_0 = arith.constant 0 : i32
    return %arg0, %arg1, %c0_i32 : i32, i32, i32
  }
  func.func @transform_1(%arg0: i32, %arg1: i32) -> (i32, i32) {
    %c0_i32 = arith.constant 0 : i32
    %c0_i32_0 = arith.constant 0 : i32
    %c0_i32_1 = arith.constant 0 : i32
    return %c0_i32, %c0_i32_0 : i32, i32
  }
  func.func @transform_2(%arg0: i32, %arg1: i32) -> (i32, i32) {
    %c0_i32 = arith.constant 0 : i32
    %c0_i32_0 = arith.constant 0 : i32
    %c0_i32_1 = arith.constant 0 : i32
    return %c0_i32, %c0_i32_0 : i32, i32
  }
  func.func @transform_3(%arg0: i32, %arg1: i32) -> (i32, i32, i32) {
    %c0_i32 = arith.constant 0 : i32
    %c0_i32_0 = arith.constant 0 : i32
    return %arg0, %c0_i32, %arg1 : i32, i32, i32
  }
}

</mosaic_0001>

<bundles_post_ra>
// kernel: tpu_custom_call.1
= control target key start
LH: loop header
LB: loop body
LE: loop exit
PB: predicated region body
PF: predicated region fallthrough
CT: control target
= control target key end

     0   :  { %8 = vsyncpa [#allocation3], 0  ;;  %s553_s12 = smov 0   ;;  %s555_s13 = smov 0   ;;  %s635_s0 = inlined_call_operand.vmem [shape: f32[2,8,32], index: 0, kind: input, shape index: {}]   ;;  %s636_s1 = inlined_call_operand.hbm [shape: f32[16,32], index: 1, kind: input, shape index: {}]   ;;  %s637_s2 = inlined_call_operand.vmem [shape: f32[16,1], index: 2, kind: input, shape index: {}]   ;;  %s638_s3 = inlined_call_operand.vmem [shape: f32[2,16,8], index: 3, kind: output, shape index: {}]  }
   0x1   :  { %s557_s14 = smov 0  }
   0x2 LB: > { %s410_s15 = sadd.s32 4294967295, %s527_s14   ;;  %s26_s16 = sadd.s32 1, %s523_s13  ;;  %s527_s14 = sphi %s557_s14, %s14_s14   ;;  %s523_s13 = sphi %s555_s13, %s648_s13   ;;  %s519_s12 = sphi %s553_s12, %s647_s12  }
   0x3   : > { %p28_p0 = scmp.ge.s32.totalorder %s26_s16, 2  ;;  %p412_p1 = scmp.ge.s32.totalorder %s527_s14, 1 }
   0x4   : > { %p129_p2 = scmp.lt.s32.totalorder %s527_s14, 3  ;;  %p578_p4 = scmp.eq.s32.totalorder %s410_s15, 0 }
   0x5   : > { %s650_s16 = smov (%p28_p0, %s26_s16), 0  ;;  %s529_s19 = smov [#allocation2]  }
   0x6   : > { %p574_p3 = pnand %p412_p1, %p129_p2  ;;  %s141_s20 = sshll.u32 %s529_s19, 4  ;;  %s142_s20 = int_to_ptr.vmem [resolvable:$true] %s141_s20 }
   0x7   : > { %s643_s18 = scalar_select %p578_p4, 1, 0 }
   0x8   : > { %s642_s17 = scalar_select %p574_p3, 1, 0 }
   0x9   : > { %p438_p5 = pneg %p574_p3  ;;  %s473_s24 = scalar_lea.hbm %s636_s1, 256 }
   0xa   : > { %p474_p7 = scmp.ne.s32.totalorder %s636_s1, %s473_s24  ;;  %p480_p11 = scmp.lt.u32.totalorder %s473_s24, %s636_s1 }
   0xb   : > { %p586_p6 = pnand %p578_p4, %p438_p5 }
   0xd   : > { %p475_p8 = pneg %p586_p6 }
   0xf   : > { %p476_p9 = pnand %p475_p8, %p474_p7 }
  0x11   : > { %p477_p10 = pneg %p476_p9 }
  0x13   : > { %p482_p12 = pnand %p480_p11, %p477_p10 }
  0x15   : > { %485 = shalt.err (!%p482_p12)
}
  0x16   : > { %s486_s29 = scalar_lea.vmem %s142_s20, 256  ;;  %p494_p2 = scmp.lt.s32.totalorder %s142_s20, %s142_s20 }
  0x17   : > { %p487_p13 = scmp.ne.s32.totalorder %s142_s20, %s486_s29  ;;  %p495_p5 = scmp.lt.s32.totalorder %s486_s29, %s486_s29 }
  0x19   : > { %p489_p0 = pnand %p487_p13, %p475_p8  ;;  %p496_p4 = por %p495_p5, %p494_p2 }
  0x1b   : > { %p490_p1 = pneg %p489_p0 }
  0x1d   : > { %p497_p3 = pnand %p496_p4, %p490_p1 }
  0x1f   : > { %500 = shalt.err (!%p497_p3)
}
  0x20   : > { %s530_s30 = smov 128   ;;  %s531_s4 = smov 8  }
  0x21   : > { %441 = dma.hbm_to_vmem [thread:$0]  (!%p586_p6), %s636_s1, 256, %s142_s20, [#allocation3], %s530_s30, %s530_s30, %s531_s4  }
  0x22   : > { %p645_p7 = scmp.ne.s32.totalorder %s642_s17, 0 }
  0x23   : > { %p646_p9 = scmp.ne.s32.totalorder (!%p645_p7), %s643_s18, 0 }
  0x24   : > { %170 = sbr.rel (%p645_p7) target bundleno = 270 (0x10e), region = 32 }
  0x2b   : > { %514 = dma.done.wait (%p646_p9), [#allocation3], 256  }
  0x2c   : > { %516 = vsyncadd (%p646_p9), [#allocation3], 4294967040  ;;  %p199_p3 = scmp.lt.s32.totalorder %s519_s12, 1  ;;  %v532_v0 = vmov 0   ;;  %vm229_vm0 = vcmask 261120   ;;  %v215_v2 = vld [vmem:[#allocation2] sm:$0xff] }
  0x2d   : > { %472 = vset.pattern.permute.xlu0 %v532_v0  ;;  %431 = vmatprep.mubr.msk.f32.mxu0 %vm229_vm0, %v215_v2  ;;  %v217_v3 = vld [vmem:[%s637_s2] sm:$0xff]  ;;  %v216_v4 = vld [vmem:[#allocation2 + $0x8] sm:$0xff]  ;;  %vm314_vm1 = vcmask 64512  }
  0x2e   : > { %s652_s12 = smov (!%p199_p3, %s519_s12), 1  ;;  %221 = vperm.xlu0 %472, %v217_v3   ;;  %v218_v5 = vld [vmem:[%s637_s2 + $0x8] sm:$0xff] }
  0x2f   : > { %s417_s7 = sshll.u32 %s652_s12, 3  ;;  %s425_s19 = sshll.u32 %s652_s12, 4 }
  0x30   : > { %s205_s10 = scalar_lea.vmem %s635_s0, %s417_s7  ;;  %s213_s22 = scalar_lea.vmem %s638_s3, %s425_s19 }
  0x31   : > { %v214_v1 = vld [vmem:[%s205_s10] sm:$0xff] }
  0x32   : > { %429 = vmatprep.subr.msk.mxu0 %vm229_vm0, %v214_v1  ;;  %226 = vperm.xlu0 %472, %v218_v5  }
  0x33   : > { %430 = vmatpush3.xpose.msk.msra.mxu0 %vm229_vm0, %v214_v1 }
  0x36   : > { %432 = vmatmul.mubr.msk.f32.vlgmr.msra.gmra.mrb[0].mxu0 %vm229_vm0, %v216_v4 }
  0xad   : > { %v222_v6 = vpop.permute.xlu0 %221 }
  0xb1   : > { %v227_v7 = vpop.permute.xlu0 %226 }
 0x109   : > { %v433_v8 = vpop.f32.mrb[0].mxu0 }
 0x10a   : > { %v311_v9 = vadd.f32 %v433_v8, %v227_v7  ;;  %v305_v10 = vpop.f32.mrb[1].mxu0 }
 0x10b   : > { %v306_v11 = vadd.f32 %v305_v10, %v222_v6 }
 0x10c   : > { %316 = vst.msk [vmem:[%s213_s22 + $0x8] sm:$0xff] %vm314_vm1, %v311_v9 }
 0x10d   : > { %315 = vst.msk [vmem:[%s213_s22] sm:$0xff] %vm314_vm1, %v306_v11 }
 0x10e PF: > { %s14_s14 = sadd.s32 1, %s527_s14   ;;  %s647_s12 = smov %s523_s13 }
 0x10f   : > { %p11_p4 = scmp.ge.s32.totalorder %s14_s14, 4   ;;  %s648_s13 = smov %s650_s16 }
 0x111   :  { %13 = sbr.rel (!%p11_p4) target bundleno = 2 (0x2), region = 67 }
 0x118   :  { %344 = vsyncpa [#allocation3], 1 }
 0x119   :  { %346 = vsyncpa [#allocation3 + $0x1], 1 }

</bundles_post_ra>
